<compile_context>
chip_gen: v5e
topology: v5e:2x2
jax: 0.10.0
libtpu: 0.0.40
codegen_flags: <defaults>
</compile_context>

<pallas_src>
import functools

import jax
import jax.numpy as jnp
from jax.experimental import pallas as pl
from jax.experimental.pallas import tpu as pltpu


# ---------------------------------------------------------------------------
# Tunables / budgets
# ---------------------------------------------------------------------------
_MAX_TM = 64            # max rows gathered per grid step (concurrent row DMAs)
_TABLE_MAX_ROWS = 4096  # cap on N for the one-hot-matmul resident-table path


def _round_up(x, m):
    return (x + m - 1) // m * m


def _budgets():
    """Per-generation VMEM budgets (v7x: 64 MiB/TC; v5e/v6e: 128 MiB)."""
    vmem_bytes = 64 * 1024 * 1024  # conservative default = v7x per-TensorCore VMEM
    try:
        info = pltpu.get_tpu_info()
        for attr in ("vmem_capacity_bytes", "vmem_bytes"):
            val = getattr(info, attr, None)
            if isinstance(val, (int, float)) and val > 0:
                vmem_bytes = int(val)
                break
    except Exception:
        pass
    vmem_limit = min(vmem_bytes * 3 // 4, 96 * 1024 * 1024)   # 48 MiB v7x / 96 MiB v5e,v6e
    table_budget = min(vmem_bytes // 4, 32 * 1024 * 1024)     # 16 MiB v7x / 32 MiB v5e,v6e
    tile_budget = min(vmem_bytes // 8, 16 * 1024 * 1024)      # 8 MiB v7x / 16 MiB v5e,v6e
    return vmem_limit, table_budget, tile_budget


_VMEM_LIMIT_BYTES, _TABLE_VMEM_BYTES, _TILE_BYTES = _budgets()


def _rows_per_tile(row_bytes, budget):
    if row_bytes <= 0:
        return _MAX_TM
    return int(min(_MAX_TM, (budget // row_bytes) // 8 * 8))


def _pick_tm(m, tm_cap):
    """Rows per step: multiple of 8, <= tm_cap, minimizing padded rows (prefer larger tm)."""
    tm_cap = max(8, min(_MAX_TM, tm_cap // 8 * 8))
    best_tm, best_pad = 8, _round_up(m, 8)
    for tm in range(8, tm_cap + 1, 8):
        m_pad = _round_up(m, tm)
        if m_pad <= best_pad:
            best_tm, best_pad = tm, m_pad
    return best_tm, best_pad


# ---------------------------------------------------------------------------
# Path 1: whole table resident in VMEM (small tables) — vectorised one-hot
# gather on the MXU, lane-dense stores.
# ---------------------------------------------------------------------------
def _make_table_gather_kernel(tm, n_pad):
    def kernel(idx_ref, table_ref, out_ref):
        # idx_ref:   VMEM (tm, 1) int32   — this step's gather indices
        # table_ref: VMEM (n_pad, d128)   — whole table, resident, single-buffered
        # out_ref:   VMEM (tm, d128)      — lane-dense output tile
        rows = idx_ref[...]                                             # (tm, 1)
        row_ids = jax.lax.broadcasted_iota(jnp.int32, (tm, n_pad), 1)   # (tm, n_pad)
        one_hot = (row_ids == rows).astype(jnp.float32)                 # exact 0/1
        gathered = jnp.dot(one_hot, table_ref[...].astype(jnp.float32),
                           preferred_element_type=jnp.float32)
        out_ref[...] = gathered.astype(out_ref.dtype)
    return kernel


def _table_gather_call(preds_2d, idx, tm, d128):
    n, d = preds_2d.shape
    m_pad = idx.shape[0]
    itemsize = preds_2d.dtype.itemsize
    n_pad = _round_up(n, 8)
    if (n_pad, d128) != (n, d):
        # Lane/sublane-align the small resident table.  Padded rows/cols are
        # never selected: idx < n, and padded one-hot columns are all zero.
        preds_2d = jnp.pad(preds_2d, ((0, n_pad - n), (0, d128 - d)))
    idx2d = idx.reshape(m_pad, 1)
    return pl.pallas_call(
        _make_table_gather_kernel(tm, n_pad),
        out_shape=jax.ShapeDtypeStruct((m_pad, d128), preds_2d.dtype),
        grid_spec=pltpu.PrefetchScalarGridSpec(
            num_scalar_prefetch=0,
            grid=(m_pad // tm,),
            in_specs=[
                pl.BlockSpec((tm, 1), lambda i: (i, 0)),
                # Whole table as a single un-pipelined VMEM operand: fetched
                # once and single-buffered (no 2x footprint from the default
                # double-buffering of pipelined blocks).
                pl.BlockSpec(memory_space=pltpu.MemorySpace.VMEM),
            ],
            out_specs=pl.BlockSpec((tm, d128), lambda i: (i, 0)),
        ),
        compiler_params=pltpu.CompilerParams(
            dimension_semantics=("parallel",),
            vmem_limit_bytes=_VMEM_LIMIT_BYTES,
        ),
        cost_estimate=pl.CostEstimate(
            flops=2 * m_pad * n_pad * d128,
            transcendentals=0,
            bytes_accessed=(n_pad * d128 + m_pad * d128) * itemsize + m_pad * 4,
        ),
    )(idx2d, preds_2d)


# ---------------------------------------------------------------------------
# Path 2: preds stays in HBM; tm concurrent per-row DMAs land directly in the
# pipelined output tile (no VMEM scratch, no VMEM->VMEM copy).
# ---------------------------------------------------------------------------
def _make_dma_gather_kernel(tm):
    def kernel(idx_ref, preds_hbm, out_ref, sems):
        # idx_ref:   SMEM (m_pad,) int32 (scalar-prefetched)
        # preds_hbm: HBM  (N, D) — never copied wholesale
        # out_ref:   VMEM (tm, D) pipelined output tile — DMA'd into directly
        # sems:      (tm,) DMA semaphores, one per in-flight row gather
        base = pl.program_id(0) * tm
        copies = []
        for r in range(tm):  # static unroll: tm concurrent row DMAs in flight
            row = idx_ref[base + r]
            cp = pltpu.make_async_copy(
                preds_hbm.at[pl.ds(row, 1)],
                out_ref.at[pl.ds(r, 1)],
                sems.at[r],
            )
            cp.start()
            copies.append(cp)
        for cp in copies:
            cp.wait()
    return kernel


def _dma_gather_call(preds_2d, idx, tm):
    n, d = preds_2d.shape
    m_pad = idx.shape[0]
    itemsize = preds_2d.dtype.itemsize
    return pl.pallas_call(
        _make_dma_gather_kernel(tm),
        out_shape=jax.ShapeDtypeStruct((m_pad, d), preds_2d.dtype),
        grid_spec=pltpu.PrefetchScalarGridSpec(
            num_scalar_prefetch=1,
            grid=(m_pad // tm,),
            in_specs=[pl.BlockSpec(memory_space=pl.ANY)],  # preds stays in HBM
            out_specs=pl.BlockSpec((tm, d), lambda i, idx_ref: (i, 0)),
            scratch_shapes=[pltpu.SemaphoreType.DMA((tm,))],
        ),
        compiler_params=pltpu.CompilerParams(
            dimension_semantics=("parallel",),
            vmem_limit_bytes=_VMEM_LIMIT_BYTES,
        ),
        cost_estimate=pl.CostEstimate(
            flops=0,
            transcendentals=0,
            bytes_accessed=2 * m_pad * d * itemsize + m_pad * 4,
        ),
    )(idx, preds_2d)


# ---------------------------------------------------------------------------
# Dispatcher
# ---------------------------------------------------------------------------
@functools.partial(jax.jit, static_argnames=("path",))
def _gather_rows_2d(preds_2d, idx, path=None):
    """preds_2d: (N, D); idx: (M,) int32 in [0, N) -> (M, D) = preds_2d[idx]."""
    n, d = preds_2d.shape
    m = idx.shape[0]
    itemsize = preds_2d.dtype.itemsize
    d128 = _round_up(d, 128)

    # Rows per grid step so the output tile (and its double buffer) fits the budget.
    table_cap = _rows_per_tile(d128 * itemsize, _TILE_BYTES // 2)
    dma_cap = _rows_per_tile(d * itemsize, _TILE_BYTES)

    if path is None:
        table_ok = (
            jnp.issubdtype(preds_2d.dtype, jnp.floating)
            and n <= _TABLE_MAX_ROWS
            and _round_up(n, 8) * d128 * itemsize <= _TABLE_VMEM_BYTES
            and table_cap >= 8
        )
        path = "table" if table_ok else "dma"

    if path == "dma" and dma_cap < 8:
        # A single row is wider than the tile budget (>~1 MiB/row): a Pallas
        # gather would need ragged column tiling; such extreme shapes are out
        # of scope for this module, so delegate them to XLA's gather.
        return jnp.take(preds_2d, idx, axis=0)

    tm, m_pad = _pick_tm(m, table_cap if path == "table" else dma_cap)
    if m_pad != m:
        idx = jnp.pad(idx, (0, m_pad - m))  # pad with row 0 (valid); cropped below

    if path == "table":
        out = _table_gather_call(preds_2d, idx, tm, d128)
        return out[:m, :d]
    out = _dma_gather_call(preds_2d, idx, tm)
    return out[:m]


class IdentityPallas:
    """Pallas equivalent of the PyTorch `Identity` module: forward -> preds[idx]."""

    def __init__(self):
        pass  # no parameters

    def __call__(self, preds, seed_idx, idx, *, force_path=None):
        del seed_idx  # unused, mirroring the PyTorch forward
        preds = jnp.asarray(preds)
        idx = jnp.asarray(idx, dtype=jnp.int32)
        n = preds.shape[0]

        # Safety: Pallas does not bounds-check data-dependent row indices.
        # Wrap negatives (PyTorch semantics) and clamp into [0, N-1].
        idx = jnp.where(idx < 0, idx + n, idx)
        idx = jnp.clip(idx, 0, n - 1)

        if preds.ndim == 1:
            # Lane-width-1 gather: a Pallas kernel would waste 127/128 of every
            # vreg/DMA — delegate to XLA's gather (per the perf review).
            return jnp.take(preds, idx, axis=0)

        orig_shape = preds.shape
        flat = preds.reshape(n, -1)
        out = _gather_rows_2d(flat, idx, path=force_path)
        return out.reshape((idx.shape[0],) + orig_shape[1:])


if __name__ == "__main__":
    key = jax.random.PRNGKey(0)
    k_preds, k_idx, k_seed, k_big = jax.random.split(key, 4)

    # Small deterministic example: preds over 64 "nodes", 128 features each.
    N, D, M = 64, 128, 8
    preds = jax.random.normal(k_preds, (N, D), dtype=jnp.float32)
    idx = jax.random.randint(k_idx, (M,), 0, N, dtype=jnp.int32)
    seed_idx = jax.random.randint(k_seed, (4,), 0, N, dtype=jnp.int32)  # unused

    model = IdentityPallas()
    ref = preds[idx]

    # Resident-table (vectorised one-hot / MXU gather) path — auto-selected here.
    out_table = jax.block_until_ready(model(preds, seed_idx, idx))
    assert out_table.shape == ref.shape and out_table.dtype == ref.dtype
    assert bool(jnp.array_equal(out_table, ref))

    # HBM per-row-DMA path (forced so it is exercised), single grid step.
    out_dma = jax.block_until_ready(model(preds, seed_idx, idx, force_path="dma"))
    assert bool(jnp.array_equal(out_dma, ref))

    # HBM path over several grid steps (M=80 -> tm=40, 2 steps).
    idx_big = jax.random.randint(k_big, (80,), 0, N, dtype=jnp.int32)
    out_big = jax.block_until_ready(model(preds, seed_idx, idx_big, force_path="dma"))
    assert bool(jnp.array_equal(out_big, preds[idx_big]))

    # Negative indices wrap like PyTorch/NumPy.
    idx_mixed = jnp.array([0, -1, 5, -N], dtype=jnp.int32)
    out_mixed = jax.block_until_ready(model(preds, seed_idx, idx_mixed))
    assert bool(jnp.array_equal(out_mixed, preds[idx_mixed]))

    # Higher-rank preds (flattened to lane rows inside the wrapper).
    preds_3d = jax.random.normal(k_preds, (N, 4, 32), dtype=jnp.float32)
    out_3d = jax.block_until_ready(model(preds_3d, seed_idx, idx))
    assert bool(jnp.array_equal(out_3d, preds_3d[idx]))

    # Ragged flattened feature width (4*25=100): table path pads to 128 lanes
    # (lane-dense stores), DMA path gathers at natural width (no table pad).
    preds_ragged = jax.random.normal(k_preds, (N, 4, 25), dtype=jnp.float32)
    out_ragged = jax.block_until_ready(model(preds_ragged, seed_idx, idx))
    assert bool(jnp.array_equal(out_ragged, preds_ragged[idx]))
    out_ragged_dma = jax.block_until_ready(
        model(preds_ragged, seed_idx, idx, force_path="dma"))
    assert bool(jnp.array_equal(out_ragged_dma, preds_ragged[idx]))

    # Non-float preds -> auto-dispatched to the dtype-agnostic DMA path.
    preds_int = jax.random.randint(k_preds, (N, D), 0, 1000, dtype=jnp.int32)
    out_int = jax.block_until_ready(model(preds_int, seed_idx, idx))
    assert bool(jnp.array_equal(out_int, preds_int[idx]))

    # 1-D preds (typical deepIS probabilities): delegated to XLA gather.
    preds_1d = jax.random.uniform(k_preds, (N,), dtype=jnp.float32)
    out_1d = jax.block_until_ready(model(preds_1d, seed_idx, idx))
    assert bool(jnp.array_equal(out_1d, preds_1d[idx]))

    print("KERNEL_OK")
</pallas_src>

<mosaic_0001>
module attributes {stable_mosaic.version = 11 : i64} {
  func.func @kernel(%arg0: i32, %arg1: memref<8x1xi32, #tpu.memory_space<vmem>>, %arg2: memref<64x128xf32, #tpu.memory_space<vmem>>, %arg3: memref<8x128xf32, #tpu.memory_space<vmem>>) attributes {dimension_semantics = [#tpu.dimension_semantics<parallel>], iteration_bounds = array<i64: 1>, scalar_prefetch = 0 : i64, scratch_operands = 0 : i64, tpu.core_type = #tpu.core_type<tc>, window_params = [{transform_indices = @transform_0, window_bounds = array<i64: 8, 1>}, {pipeline_mode = #tpu.pipeline_mode<synchronous>, transform_indices = @transform_1, window_bounds = array<i64: 64, 128>}, {transform_indices = @transform_2, window_bounds = array<i64: 8, 128>}]} {
    %c0 = arith.constant 0 : index
    %c0_0 = arith.constant 0 : index
    %0 = vector.load %arg1[%c0, %c0_0] : memref<8x1xi32, #tpu.memory_space<vmem>>, vector<8x1xi32>
    %1 = tpu.iota {dimensions = array<i32: 1>} : vector<8x64xi32>
    %2 = vector.broadcast %0 : vector<8x1xi32> to vector<8x64xi32>
    %3 = arith.cmpi eq, %1, %2 : vector<8x64xi32>
    %4 = arith.extui %3 : vector<8x64xi1> to vector<8x64xi32>
    %5 = arith.sitofp %4 : vector<8x64xi32> to vector<8x64xf32>
    %c0_1 = arith.constant 0 : index
    %c0_2 = arith.constant 0 : index
    %6 = vector.load %arg2[%c0_1, %c0_2] : memref<64x128xf32, #tpu.memory_space<vmem>>, vector<64x128xf32>
    %cst = arith.constant dense<0.000000e+00> : vector<8x128xf32>
    %7 = tpu.matmul %5, %6, %cst {dimension_numbers = #tpu.dot_dimension_numbers<[1], [0], [0], [1], [0, 0, 1, 1], [], []>} : vector<8x64xf32>, vector<64x128xf32>, vector<8x128xf32> -> vector<8x128xf32>
    %c0_3 = arith.constant 0 : index
    %c0_4 = arith.constant 0 : index
    %8 = vector.load %arg3[%c0_3, %c0_4] : memref<8x128xf32, #tpu.memory_space<vmem>>, vector<8x128xf32>
    tpu.vector_store %arg3[%c0_3, %c0_4], %7 {strides = array<i32>} : memref<8x128xf32, #tpu.memory_space<vmem>>, vector<8x128xf32>,
    return
  }
  func.func @transform_0(%arg0: i32) -> (i32, i32) {
    %c0_i32 = arith.constant 0 : i32
    %c0_i32_0 = arith.constant 0 : i32
    return %arg0, %c0_i32 : i32, i32
  }
  func.func @transform_1(%arg0: i32) -> (i32, i32) {
    %c0_i32 = arith.constant 0 : i32
    %c0_i32_0 = arith.constant 0 : i32
    %c0_i32_1 = arith.constant 0 : i32
    return %c0_i32, %c0_i32_0 : i32, i32
  }
  func.func @transform_2(%arg0: i32) -> (i32, i32) {
    %c0_i32 = arith.constant 0 : i32
    %c0_i32_0 = arith.constant 0 : i32
    return %arg0, %c0_i32 : i32, i32
  }
}

</mosaic_0001>

<bundles_post_ra>
// kernel: _gather_rows_2d.1
= control target key start
LH: loop header
LB: loop body
LE: loop exit
PB: predicated region body
PF: predicated region fallthrough
CT: control target
= control target key end

     0   :  { %7 = vsyncpa [#allocation3], 0  ;;  %s178_s0 = inlined_call_operand.vmem [shape: s32[8,1], index: 0, kind: input, shape index: {}]   ;;  %s179_s1 = inlined_call_operand.hbm [shape: f32[64,128], index: 1, kind: input, shape index: {}]   ;;  %s180_s2 = inlined_call_operand.hbm [shape: f32[8,128], index: 2, kind: output, shape index: {}]  }
   0x1   :  { %8 = vsyncpa [#allocation4], 0  ;;  %s15_s11 = sshll.u32 %s179_s1, 4  ;;  %s148_s12 = smov [#allocation2]   ;;  %s16_s11 = int_to_ptr.hbm [resolvable:$true] %s15_s11 }
   0x2   :  { %s17_s13 = sshll.u32 %s148_s12, 4  ;;  %s149_s14 = smov 128   ;;  %s18_s13 = int_to_ptr.vmem [resolvable:$true] %s17_s13 }
   0x3   :  { %s150_s15 = smov 8  }
   0x4   :  { %23 = dma.hbm_to_vmem [thread:$0]  %s16_s11, 1024, %s18_s13, [#allocation3], %s149_s14, %s149_s14, %s150_s15  }
   0x5   :  { %144 = dma.done.wait [#allocation3], 1024  }
   0x6   :  { %145 = vsyncadd [#allocation3], 4294966272  ;;  %v151_v0 = vmov 0   ;;  %v28_v1 = vld [vmem:[%s178_s0] sm:$0xff]  ;;  %v44_v2 = vld [vmem:[#allocation2 + $0x38] sm:$0xff]  ;;  %v29_v10 = vlaneseq  ;;  %vm45_vm0 = vcmask 523264  }
   0x7   :  { %95 = vset.pattern.permute.xlu0 %v151_v0  ;;  %v43_v3 = vld [vmem:[#allocation2 + $0x30] sm:$0xff]  ;;  %57 = vmatpush.msra.mxu0 %v44_v2  ;;  %v42_v4 = vld [vmem:[#allocation2 + $0x28] sm:$0xff]  ;;  %v41_v5 = vld [vmem:[#allocation2 + $0x20] sm:$0xff]  ;;  %v152_v13 = vmov 0.0   ;;  %s153_s0 = smov [#allocation5]   ;;  %s77_s20 = sshll.u32 %s180_s2, 4  ;;  %s78_s20 = int_to_ptr.hbm [resolvable:$true] %s77_s20 }
   0x8   :  { %32 = vperm.xlu0 %95, %v28_v1   ;;  %v40_v6 = vld [vmem:[#allocation2 + $0x18] sm:$0xff]  ;;  %v39_v7 = vld [vmem:[#allocation2 + $0x10] sm:$0xff]  ;;  %v38_v8 = vld [vmem:[#allocation2 + $0x8] sm:$0xff]  ;;  %v30_v11 = vand.u32 127, %v29_v10  ;;  %s75_s1 = sshll.u32 %s153_s0, 4  ;;  %s76_s1 = int_to_ptr.vmem [resolvable:$true] %s75_s1 }
   0x9   :  { %58 = vmatpush.msra.mxu0 %v43_v3  ;;  %v37_v9 = vld [vmem:[#allocation2] sm:$0xff] }
   0xb   :  { %59 = vmatpush.msra.mxu0 %v42_v4 }
   0xd   :  { %60 = vmatpush.msra.mxu0 %v41_v5 }
   0xf   :  { %61 = vmatpush.msra.mxu0 %v40_v6 }
  0x11   :  { %62 = vmatpush.msra.mxu0 %v39_v7 }
  0x13   :  { %63 = vmatpush.msra.mxu0 %v38_v8 }
  0x15   :  { %64 = vmatpush.msra.mxu0 %v37_v9 }
  0x7a   :  { %v33_v12 = vpop.permute.xlu0 %32 }
  0x7b   :  { %vm34_vm1 = vcmp.eq.s32.totalorder %v30_v11, %v33_v12 }
  0x7c   :  { %v87_v14 = vsel %vm34_vm1, 1.0, %v152_v13 }
  0x7d   :  { %88 = vmatmul.msk.f32.vlgmr.msra.gmra.mxu0 %vm45_vm0, %v87_v14 }
  0xfa   :  { %v66_v15 = vpop.f32.mrf.mxu0 }
  0xfb   :  { %69 = vst [vmem:[#allocation5] sm:$0xff] %v66_v15 }
  0xfc   :  { %80 = dma.vmem_to_hbm [thread:$0]  %s76_s1, 128, %s78_s20, [#allocation4]  }
  0xfd   :  { %146 = dma.done.wait [#allocation4], 128  }
  0xfe   :  { %147 = vsyncadd [#allocation4], 4294967168 }
  0xff   :  { %85 = vsyncpa [#allocation3], 1 }
 0x100   :  { %86 = vsyncpa [#allocation4], 1 }

</bundles_post_ra>
